<compile_context>
chip_gen: v6e
topology: v6e:2x2x1
jax: 0.10.0
libtpu: 0.0.40
codegen_flags: <defaults>
</compile_context>

<pallas_src>
import functools

import jax
import jax.numpy as jnp
from jax import lax
from jax.experimental import pallas as pl
from jax.experimental.pallas import tpu as pltpu


_HALO = 8  # row granularity of the halo BlockSpecs (sublane-tile aligned)


# ------------------------------ VMEM planning -------------------------------
def _vmem_budget():
    cap = 64 * 1024 * 1024  # conservative default: v7x per-TC VMEM
    try:
        info = pltpu.get_tpu_info()
        cap = int(getattr(info, "vmem_capacity_bytes", cap) or cap)
    except Exception:
        pass
    budget = int(cap * 0.45)                       # what the tile picker plans to use
    limit = min(int(cap * 0.80), 100 * 1024 * 1024)  # Mosaic limit, with headroom
    return budget, limit


def _pick_tile_h(N, H, W, Cin, Cout, K, pad, itemsize, budget_bytes):
    """Largest tile height TH (divisor of H, multiple of 8 when tiling) whose
    honest per-step VMEM footprint fits the budget.  Tiled blocks require
    W % 16 == 0 so the flattened (.., TH*W) / (.., 8*W) blocks are 128-lane
    aligned; otherwise fall back to a single full-height tile."""
    cands = {H}
    if H % _HALO == 0 and W % 16 == 0:
        cands.update(th for th in range(_HALO, H, _HALO) if H % th == 0)

    def footprint(th):
        gh = H // th
        thw = th * W
        b = 2 * (Cin + Cout) * thw * itemsize            # center in + out (double-buffered)
        if gh > 1:
            b += 2 * 2 * Cin * _HALO * W * itemsize      # two 8-row halo blocks (double-buffered)
        if K > 1:
            b += Cin * ((th + 2 * pad) * W + 2 * pad) * 4  # padded-slab scratch
            b += Cin * thw * 4                             # depthwise accumulator
            b += 2 * K * thw * 4                           # column masks (double-buffered)
        b += Cout * thw * 4                              # matmul result staging
        b += 2 * (K * K * Cin + Cout * Cin + Cout) * 4   # weights / shift
        return b

    fits = sorted(th for th in cands if footprint(th) <= budget_bytes)
    if not fits:
        return min(cands)
    th = fits[-1]
    if N == 1 and th == H:
        # keep >= 2 grid steps so both v7x TensorCores have work
        smaller = [t for t in fits if t < H]
        if smaller:
            th = smaller[-1]
    return th


# ------------------------- fused kernel (K > 1 path) ------------------------
def _make_fused_kernel(*, K, pad, TH, W, GH, has_halo):
    THW = TH * W
    Lp = (TH + 2 * pad) * W          # padded-slab content length
    CSTART = pad + pad * W           # where tile row 0 / col 0 lands in the scratch

    def kernel(*refs):
        if has_halo:
            x_c, x_top, x_bot, w_dw, w_pw, shift, cmask, o_ref, xpad = refs
        else:
            x_c, w_dw, w_pw, shift, cmask, o_ref, xpad = refs
        Cin = x_c.shape[1]
        h = pl.program_id(1)

        # ---- assemble the padded slab: only guards / pad rows / halo rows
        #      are written beyond the center copy (no full zero-fill). ----
        xpad[:, 0:pad] = jnp.zeros((Cin, pad), jnp.float32)                       # left guard
        xpad[:, pad + Lp:pad + Lp + pad] = jnp.zeros((Cin, pad), jnp.float32)     # right guard
        xpad[:, CSTART:CSTART + THW] = x_c[0].astype(jnp.float32)                 # center tile

        top_lo, top_hi = pad, pad + pad * W
        bot_lo, bot_hi = pad + (TH + pad) * W, pad + Lp
        if has_halo:
            @pl.when(h == 0)
            def _():
                xpad[:, top_lo:top_hi] = jnp.zeros((Cin, pad * W), jnp.float32)

            @pl.when(h > 0)
            def _():
                xpad[:, top_lo:top_hi] = x_top[0, :, (_HALO - pad) * W:].astype(jnp.float32)

            @pl.when(h == GH - 1)
            def _():
                xpad[:, bot_lo:bot_hi] = jnp.zeros((Cin, pad * W), jnp.float32)

            @pl.when(h < GH - 1)
            def _():
                xpad[:, bot_lo:bot_hi] = x_bot[0, :, :pad * W].astype(jnp.float32)
        else:
            xpad[:, top_lo:top_hi] = jnp.zeros((Cin, pad * W), jnp.float32)
            xpad[:, bot_lo:bot_hi] = jnp.zeros((Cin, pad * W), jnp.float32)

        # ---- depthwise: K*K slab-wide FMAs (VPU).  Static lane offsets; the
        #      per-kw column mask zeroes the row-wrap / image-border lanes. ----
        acc = None
        for kw in range(K):
            part = None
            for kh in range(K):
                d = kh * W + kw
                tap = xpad[:, d:d + THW] * w_dw[kh * K + kw]   # (Cin,THW)*(Cin,1)
                part = tap if part is None else part + tap
            if kw != pad:                                      # center column: mask is all-ones
                part = part * cmask[kw]                        # (Cin,THW)*(1,THW)
            acc = part if acc is None else acc + part

        # ---- ONE MXU matmul for the whole tile, BN shift + ReLU, single
        #      lane-dense output store. ----
        y = jnp.dot(w_pw[...], acc, preferred_element_type=jnp.float32)
        y = jnp.maximum(y + shift[...], 0.0)
        o_ref[0] = y.astype(o_ref.dtype)

    return kernel


# --------------------- fused kernel (K == 1, proj-only path) ----------------
def _proj_kernel(x_ref, w_pw_ref, shift_ref, o_ref):
    x = x_ref[0].astype(jnp.float32)                           # (Cin, TH*W)
    y = jnp.dot(w_pw_ref[...], x, preferred_element_type=jnp.float32)
    o_ref[0] = jnp.maximum(y + shift_ref[...], 0.0).astype(o_ref.dtype)


# ----------------------------------- module ---------------------------------
@functools.partial(jax.jit, static_argnames=("kernel_size", "padding"))
def dsc_bn_act(x_nchw, params, *, kernel_size, padding):
    """Forward of DSC_BN_ACT.  Input/output NCHW (PyTorch convention).
    BatchNorm is inference-mode (running stats folded into scale/shift)."""
    N, Cin, H, W = x_nchw.shape
    K = kernel_size
    eps = 1e-5

    # Fold BN into the 1x1 projection:
    #   relu((Wpw x) * scale + shift) == relu((Wpw*scale) x + shift)
    scale = params["bn_gamma"] / jnp.sqrt(params["bn_var"] + eps)   # (Cout,)
    shift = params["bn_beta"] - params["bn_mean"] * scale           # (Cout,)
    w_pw = params["pw_w"][:, :, 0, 0].astype(jnp.float32)           # (Cout, Cin)
    w_pw_scaled = w_pw * scale[:, None].astype(jnp.float32)
    Cout = w_pw.shape[0]
    shift2d = shift.reshape(Cout, 1).astype(jnp.float32)

    budget, vmem_limit = _vmem_budget()
    cparams = pltpu.CompilerParams(
        dimension_semantics=("parallel", "parallel"),
        vmem_limit_bytes=vmem_limit)

    x_flat = x_nchw.reshape(N, Cin, H * W)   # free view; lane dim = H*W

    # ------------------------- K == 1: proj-only path -----------------------
    if K == 1:
        TH = _pick_tile_h(N, H, W, Cin, Cout, 1, 0, x_nchw.dtype.itemsize, budget)
        GH = H // TH
        THW = TH * W
        out = pl.pallas_call(
            _proj_kernel,
            out_shape=jax.ShapeDtypeStruct((N, Cout, H * W), x_nchw.dtype),
            grid=(N, GH),
            in_specs=[
                pl.BlockSpec((1, Cin, THW), lambda n, h: (n, 0, h)),
                pl.BlockSpec((Cout, Cin), lambda n, h: (0, 0)),
                pl.BlockSpec((Cout, 1), lambda n, h: (0, 0)),
            ],
            out_specs=pl.BlockSpec((1, Cout, THW), lambda n, h: (n, 0, h)),
            compiler_params=cparams,
        )(x_flat, w_pw_scaled, shift2d)
        return out.reshape(N, Cout, H, W)

    # ------------------ K > 1: depthwise -> 1x1 -> BN -> ReLU ---------------
    assert 2 * padding == K - 1, "only 'same' padding (padding == (K-1)//2) supported"
    pad = padding
    assert 0 < pad <= _HALO, "kernel_size too large for the 8-row halo blocks"

    TH = _pick_tile_h(N, H, W, Cin, Cout, K, pad, x_nchw.dtype.itemsize, budget)
    GH = H // TH
    THW = TH * W
    has_halo = GH > 1

    # Depthwise weight (Cin,1,K,K) -> (K*K, Cin, 1); lane-broadcast in-kernel.
    w_dw = (params["dwc_w"][:, 0].astype(jnp.float32)
            .reshape(Cin, K * K).T.reshape(K * K, Cin, 1))

    # Per-kw column validity masks (handle the kw wrap across flattened row
    # boundaries and the left/right image border in one shot).
    col = jnp.arange(THW, dtype=jnp.int32) % W
    cmask = jnp.stack(
        [((col + (kw - pad) >= 0) & (col + (kw - pad) < W)).astype(jnp.float32)
         for kw in range(K)]).reshape(K, 1, THW)

    kern = _make_fused_kernel(K=K, pad=pad, TH=TH, W=W, GH=GH, has_halo=has_halo)

    in_specs = [pl.BlockSpec((1, Cin, THW), lambda n, h: (n, 0, h))]
    inputs = [x_flat]
    if has_halo:
        thb = TH // _HALO
        hb_max = H // _HALO - 1
        # 8-row halo views of the same input, clamped at the image borders
        # (border cases are masked with pl.when inside the kernel).
        in_specs.append(pl.BlockSpec(
            (1, Cin, _HALO * W),
            lambda n, h: (n, 0, jnp.maximum(h * thb - 1, 0))))
        in_specs.append(pl.BlockSpec(
            (1, Cin, _HALO * W),
            lambda n, h: (n, 0, jnp.minimum((h + 1) * thb, hb_max))))
        inputs += [x_flat, x_flat]

    in_specs += [
        pl.BlockSpec((K * K, Cin, 1), lambda n, h: (0, 0, 0)),
        pl.BlockSpec((Cout, Cin), lambda n, h: (0, 0)),
        pl.BlockSpec((Cout, 1), lambda n, h: (0, 0)),
        pl.BlockSpec((K, 1, THW), lambda n, h: (0, 0, 0)),
    ]
    inputs += [w_dw, w_pw_scaled, shift2d, cmask]

    out = pl.pallas_call(
        kern,
        out_shape=jax.ShapeDtypeStruct((N, Cout, H * W), x_nchw.dtype),
        grid=(N, GH),
        in_specs=in_specs,
        out_specs=pl.BlockSpec((1, Cout, THW), lambda n, h: (n, 0, h)),
        scratch_shapes=[
            pltpu.VMEM((Cin, (TH + 2 * pad) * W + 2 * pad), jnp.float32)],
        compiler_params=cparams,
    )(*inputs)
    return out.reshape(N, Cout, H, W)


# ----------------------------- pure-JAX reference ---------------------------
def dsc_bn_act_ref(x_nchw, params, *, kernel_size, padding):
    x = x_nchw
    if kernel_size != 1:
        x = lax.conv_general_dilated(
            x, params["dwc_w"], window_strides=(1, 1),
            padding=[(padding, padding), (padding, padding)],
            dimension_numbers=("NCHW", "OIHW", "NCHW"),
            feature_group_count=x.shape[1],
            precision=lax.Precision.HIGHEST)
    y = lax.conv_general_dilated(
        x, params["pw_w"], window_strides=(1, 1), padding="VALID",
        dimension_numbers=("NCHW", "OIHW", "NCHW"),
        precision=lax.Precision.HIGHEST)
    eps = 1e-5
    scale = params["bn_gamma"] / jnp.sqrt(params["bn_var"] + eps)
    shift = params["bn_beta"] - params["bn_mean"] * scale
    y = y * scale[None, :, None, None] + shift[None, :, None, None]
    return jnp.maximum(y, 0.0)


# ------------------------------------ test ----------------------------------
def _make_params(key, Cin, Cout, K):
    k_dw, k_pw, k_g, k_b, k_m, k_v = jax.random.split(key, 6)
    return {
        "dwc_w": jax.random.normal(k_dw, (Cin, 1, K, K), dtype=jnp.float32) * 0.2,
        "pw_w": jax.random.normal(k_pw, (Cout, Cin, 1, 1), dtype=jnp.float32) * 0.2,
        "bn_gamma": jax.random.normal(k_g, (Cout,), dtype=jnp.float32) * 0.1 + 1.0,
        "bn_beta": jax.random.normal(k_b, (Cout,), dtype=jnp.float32) * 0.1,
        "bn_mean": jax.random.normal(k_m, (Cout,), dtype=jnp.float32) * 0.1,
        "bn_var": jax.random.uniform(k_v, (Cout,), dtype=jnp.float32,
                                     minval=0.5, maxval=1.5),
    }


if __name__ == "__main__":
    key = jax.random.PRNGKey(0)
    k_x1, k_p1, k_x2, k_p2 = jax.random.split(key, 4)

    # ---- config 1: K=3 fused path (single H tile) + K=1 proj path ----
    N, Cin, H, W = 2, 4, 16, 16
    Cout, K, padding = 8, 3, 1
    x = jax.random.normal(k_x1, (N, Cin, H, W), dtype=jnp.float32)
    params = _make_params(k_p1, Cin, Cout, K)

    out3 = dsc_bn_act(x, params, kernel_size=K, padding=padding)
    jax.block_until_ready(out3)
    ref3 = dsc_bn_act_ref(x, params, kernel_size=K, padding=padding)
    assert out3.shape == (N, Cout, H, W)
    assert jnp.allclose(out3, ref3, atol=5e-3, rtol=5e-3), "K=3 path mismatch"

    out1 = dsc_bn_act(x, params, kernel_size=1, padding=0)
    jax.block_until_ready(out1)
    ref1 = dsc_bn_act_ref(x, params, kernel_size=1, padding=0)
    assert out1.shape == (N, Cout, H, W)
    assert jnp.allclose(out1, ref1, atol=5e-3, rtol=5e-3), "K=1 path mismatch"

    # ---- config 2: taller input exercising the H-tiled + halo path ----
    N2, Cin2, H2, W2, Cout2 = 1, 8, 64, 32, 16
    x2 = jax.random.normal(k_x2, (N2, Cin2, H2, W2), dtype=jnp.float32)
    params2 = _make_params(k_p2, Cin2, Cout2, K)
    out_t = dsc_bn_act(x2, params2, kernel_size=K, padding=padding)
    jax.block_until_ready(out_t)
    ref_t = dsc_bn_act_ref(x2, params2, kernel_size=K, padding=padding)
    assert out_t.shape == (N2, Cout2, H2, W2)
    assert jnp.allclose(out_t, ref_t, atol=5e-3, rtol=5e-3), "tiled/halo path mismatch"

    print("KERNEL_OK")
</pallas_src>

<mosaic_0001>
module attributes {stable_mosaic.version = 11 : i64} {
  func.func @kernel(%arg0: i32, %arg1: i32, %arg2: memref<1x4x256xf32, #tpu.memory_space<vmem>>, %arg3: memref<9x4x1xf32, #tpu.memory_space<vmem>>, %arg4: memref<8x4xf32, #tpu.memory_space<vmem>>, %arg5: memref<8x1xf32, #tpu.memory_space<vmem>>, %arg6: memref<3x1x256xf32, #tpu.memory_space<vmem>>, %arg7: memref<1x8x256xf32, #tpu.memory_space<vmem>>, %arg8: memref<4x290xf32, #tpu.memory_space<vmem>>) attributes {dimension_semantics = [#tpu.dimension_semantics<parallel>, #tpu.dimension_semantics<parallel>], iteration_bounds = array<i64: 2, 1>, scalar_prefetch = 0 : i64, scratch_operands = 1 : i64, tpu.core_type = #tpu.core_type<tc>, window_params = [{transform_indices = @transform_0, window_bounds = array<i64: 1, 4, 256>}, {pipeline_mode = #tpu.pipeline_mode<synchronous>, transform_indices = @transform_1, window_bounds = array<i64: 9, 4, 1>}, {pipeline_mode = #tpu.pipeline_mode<synchronous>, transform_indices = @transform_2, window_bounds = array<i64: 8, 4>}, {pipeline_mode = #tpu.pipeline_mode<synchronous>, transform_indices = @transform_3, window_bounds = array<i64: 8, 1>}, {pipeline_mode = #tpu.pipeline_mode<synchronous>, transform_indices = @transform_4, window_bounds = array<i64: 3, 1, 256>}, {transform_indices = @transform_5, window_bounds = array<i64: 1, 8, 256>}]} {
    %cst = arith.constant 0.000000e+00 : f32
    %0 = vector.broadcast %cst : f32 to vector<4x1xf32>
    %c0 = arith.constant 0 : index
    %c0_0 = arith.constant 0 : index
    %1 = vector.load %arg8[%c0, %c0_0] : memref<4x290xf32, #tpu.memory_space<vmem>>, vector<4x1xf32>
    tpu.vector_store %arg8[%c0, %c0_0], %0 {strides = array<i32>} : memref<4x290xf32, #tpu.memory_space<vmem>>, vector<4x1xf32>,
    %cst_1 = arith.constant 0.000000e+00 : f32
    %2 = vector.broadcast %cst_1 : f32 to vector<4x1xf32>
    %c0_2 = arith.constant 0 : index
    %c289 = arith.constant 289 : index
    %3 = vector.load %arg8[%c0_2, %c289] : memref<4x290xf32, #tpu.memory_space<vmem>>, vector<4x1xf32>
    tpu.vector_store %arg8[%c0_2, %c289], %2 {strides = array<i32>} : memref<4x290xf32, #tpu.memory_space<vmem>>, vector<4x1xf32>,
    %c0_3 = arith.constant 0 : index
    %c0_4 = arith.constant 0 : index
    %c0_5 = arith.constant 0 : index
    %4 = vector.load %arg2[%c0_3, %c0_4, %c0_5] : memref<1x4x256xf32, #tpu.memory_space<vmem>>, vector<1x4x256xf32>
    %5 = vector.shape_cast %4 : vector<1x4x256xf32> to vector<4x256xf32>
    %c0_6 = arith.constant 0 : index
    %c17 = arith.constant 17 : index
    %6 = vector.load %arg8[%c0_6, %c17] : memref<4x290xf32, #tpu.memory_space<vmem>>, vector<4x256xf32>
    tpu.vector_store %arg8[%c0_6, %c17], %5 {strides = array<i32>} : memref<4x290xf32, #tpu.memory_space<vmem>>, vector<4x256xf32>,
    %cst_7 = arith.constant 0.000000e+00 : f32
    %7 = vector.broadcast %cst_7 : f32 to vector<4x16xf32>
    %c0_8 = arith.constant 0 : index
    %c1 = arith.constant 1 : index
    %8 = vector.load %arg8[%c0_8, %c1] : memref<4x290xf32, #tpu.memory_space<vmem>>, vector<4x16xf32>
    tpu.vector_store %arg8[%c0_8, %c1], %7 {strides = array<i32>} : memref<4x290xf32, #tpu.memory_space<vmem>>, vector<4x16xf32>,
    %cst_9 = arith.constant 0.000000e+00 : f32
    %9 = vector.broadcast %cst_9 : f32 to vector<4x16xf32>
    %c0_10 = arith.constant 0 : index
    %c273 = arith.constant 273 : index
    %10 = vector.load %arg8[%c0_10, %c273] : memref<4x290xf32, #tpu.memory_space<vmem>>, vector<4x16xf32>
    tpu.vector_store %arg8[%c0_10, %c273], %9 {strides = array<i32>} : memref<4x290xf32, #tpu.memory_space<vmem>>, vector<4x16xf32>,
    %c0_11 = arith.constant 0 : index
    %c0_12 = arith.constant 0 : index
    %11 = vector.load %arg8[%c0_11, %c0_12] : memref<4x290xf32, #tpu.memory_space<vmem>>, vector<4x256xf32>
    %c0_13 = arith.constant 0 : index
    %c0_14 = arith.constant 0 : index
    %c0_15 = arith.constant 0 : index
    %12 = vector.load %arg3[%c0_13, %c0_14, %c0_15] : memref<9x4x1xf32, #tpu.memory_space<vmem>>, vector<1x4x1xf32>
    %13 = vector.shape_cast %12 : vector<1x4x1xf32> to vector<4x1xf32>
    %14 = vector.broadcast %13 : vector<4x1xf32> to vector<4x256xf32>
    %15 = arith.mulf %11, %14 : vector<4x256xf32>
    %c0_16 = arith.constant 0 : index
    %c16 = arith.constant 16 : index
    %16 = vector.load %arg8[%c0_16, %c16] : memref<4x290xf32, #tpu.memory_space<vmem>>, vector<4x256xf32>
    %c3 = arith.constant 3 : index
    %c0_17 = arith.constant 0 : index
    %c0_18 = arith.constant 0 : index
    %17 = vector.load %arg3[%c3, %c0_17, %c0_18] : memref<9x4x1xf32, #tpu.memory_space<vmem>>, vector<1x4x1xf32>
    %18 = vector.shape_cast %17 : vector<1x4x1xf32> to vector<4x1xf32>
    %19 = vector.broadcast %18 : vector<4x1xf32> to vector<4x256xf32>
    %20 = arith.mulf %16, %19 : vector<4x256xf32>
    %21 = arith.addf %15, %20 : vector<4x256xf32>
    %c0_19 = arith.constant 0 : index
    %c32 = arith.constant 32 : index
    %22 = vector.load %arg8[%c0_19, %c32] : memref<4x290xf32, #tpu.memory_space<vmem>>, vector<4x256xf32>
    %c6 = arith.constant 6 : index
    %c0_20 = arith.constant 0 : index
    %c0_21 = arith.constant 0 : index
    %23 = vector.load %arg3[%c6, %c0_20, %c0_21] : memref<9x4x1xf32, #tpu.memory_space<vmem>>, vector<1x4x1xf32>
    %24 = vector.shape_cast %23 : vector<1x4x1xf32> to vector<4x1xf32>
    %25 = vector.broadcast %24 : vector<4x1xf32> to vector<4x256xf32>
    %26 = arith.mulf %22, %25 : vector<4x256xf32>
    %27 = arith.addf %21, %26 : vector<4x256xf32>
    %c0_22 = arith.constant 0 : index
    %c0_23 = arith.constant 0 : index
    %c0_24 = arith.constant 0 : index
    %28 = vector.load %arg6[%c0_22, %c0_23, %c0_24] : memref<3x1x256xf32, #tpu.memory_space<vmem>>, vector<1x1x256xf32>
    %29 = vector.shape_cast %28 : vector<1x1x256xf32> to vector<1x256xf32>
    %30 = vector.broadcast %29 : vector<1x256xf32> to vector<4x256xf32>
    %31 = arith.mulf %27, %30 : vector<4x256xf32>
    %c0_25 = arith.constant 0 : index
    %c1_26 = arith.constant 1 : index
    %32 = vector.load %arg8[%c0_25, %c1_26] : memref<4x290xf32, #tpu.memory_space<vmem>>, vector<4x256xf32>
    %c1_27 = arith.constant 1 : index
    %c0_28 = arith.constant 0 : index
    %c0_29 = arith.constant 0 : index
    %33 = vector.load %arg3[%c1_27, %c0_28, %c0_29] : memref<9x4x1xf32, #tpu.memory_space<vmem>>, vector<1x4x1xf32>
    %34 = vector.shape_cast %33 : vector<1x4x1xf32> to vector<4x1xf32>
    %35 = vector.broadcast %34 : vector<4x1xf32> to vector<4x256xf32>
    %36 = arith.mulf %32, %35 : vector<4x256xf32>
    %c0_30 = arith.constant 0 : index
    %c17_31 = arith.constant 17 : index
    %37 = vector.load %arg8[%c0_30, %c17_31] : memref<4x290xf32, #tpu.memory_space<vmem>>, vector<4x256xf32>
    %c4 = arith.constant 4 : index
    %c0_32 = arith.constant 0 : index
    %c0_33 = arith.constant 0 : index
    %38 = vector.load %arg3[%c4, %c0_32, %c0_33] : memref<9x4x1xf32, #tpu.memory_space<vmem>>, vector<1x4x1xf32>
    %39 = vector.shape_cast %38 : vector<1x4x1xf32> to vector<4x1xf32>
    %40 = vector.broadcast %39 : vector<4x1xf32> to vector<4x256xf32>
    %41 = arith.mulf %37, %40 : vector<4x256xf32>
    %42 = arith.addf %36, %41 : vector<4x256xf32>
    %c0_34 = arith.constant 0 : index
    %c33 = arith.constant 33 : index
    %43 = vector.load %arg8[%c0_34, %c33] : memref<4x290xf32, #tpu.memory_space<vmem>>, vector<4x256xf32>
    %c7 = arith.constant 7 : index
    %c0_35 = arith.constant 0 : index
    %c0_36 = arith.constant 0 : index
    %44 = vector.load %arg3[%c7, %c0_35, %c0_36] : memref<9x4x1xf32, #tpu.memory_space<vmem>>, vector<1x4x1xf32>
    %45 = vector.shape_cast %44 : vector<1x4x1xf32> to vector<4x1xf32>
    %46 = vector.broadcast %45 : vector<4x1xf32> to vector<4x256xf32>
    %47 = arith.mulf %43, %46 : vector<4x256xf32>
    %48 = arith.addf %42, %47 : vector<4x256xf32>
    %49 = arith.addf %31, %48 : vector<4x256xf32>
    %c0_37 = arith.constant 0 : index
    %c2 = arith.constant 2 : index
    %50 = vector.load %arg8[%c0_37, %c2] : memref<4x290xf32, #tpu.memory_space<vmem>>, vector<4x256xf32>
    %c2_38 = arith.constant 2 : index
    %c0_39 = arith.constant 0 : index
    %c0_40 = arith.constant 0 : index
    %51 = vector.load %arg3[%c2_38, %c0_39, %c0_40] : memref<9x4x1xf32, #tpu.memory_space<vmem>>, vector<1x4x1xf32>
    %52 = vector.shape_cast %51 : vector<1x4x1xf32> to vector<4x1xf32>
    %53 = vector.broadcast %52 : vector<4x1xf32> to vector<4x256xf32>
    %54 = arith.mulf %50, %53 : vector<4x256xf32>
    %c0_41 = arith.constant 0 : index
    %c18 = arith.constant 18 : index
    %55 = vector.load %arg8[%c0_41, %c18] : memref<4x290xf32, #tpu.memory_space<vmem>>, vector<4x256xf32>
    %c5 = arith.constant 5 : index
    %c0_42 = arith.constant 0 : index
    %c0_43 = arith.constant 0 : index
    %56 = vector.load %arg3[%c5, %c0_42, %c0_43] : memref<9x4x1xf32, #tpu.memory_space<vmem>>, vector<1x4x1xf32>
    %57 = vector.shape_cast %56 : vector<1x4x1xf32> to vector<4x1xf32>
    %58 = vector.broadcast %57 : vector<4x1xf32> to vector<4x256xf32>
    %59 = arith.mulf %55, %58 : vector<4x256xf32>
    %60 = arith.addf %54, %59 : vector<4x256xf32>
    %c0_44 = arith.constant 0 : index
    %c34 = arith.constant 34 : index
    %61 = vector.load %arg8[%c0_44, %c34] : memref<4x290xf32, #tpu.memory_space<vmem>>, vector<4x256xf32>
    %c8 = arith.constant 8 : index
    %c0_45 = arith.constant 0 : index
    %c0_46 = arith.constant 0 : index
    %62 = vector.load %arg3[%c8, %c0_45, %c0_46] : memref<9x4x1xf32, #tpu.memory_space<vmem>>, vector<1x4x1xf32>
    %63 = vector.shape_cast %62 : vector<1x4x1xf32> to vector<4x1xf32>
    %64 = vector.broadcast %63 : vector<4x1xf32> to vector<4x256xf32>
    %65 = arith.mulf %61, %64 : vector<4x256xf32>
    %66 = arith.addf %60, %65 : vector<4x256xf32>
    %c2_47 = arith.constant 2 : index
    %c0_48 = arith.constant 0 : index
    %c0_49 = arith.constant 0 : index
    %67 = vector.load %arg6[%c2_47, %c0_48, %c0_49] : memref<3x1x256xf32, #tpu.memory_space<vmem>>, vector<1x1x256xf32>
    %68 = vector.shape_cast %67 : vector<1x1x256xf32> to vector<1x256xf32>
    %69 = vector.broadcast %68 : vector<1x256xf32> to vector<4x256xf32>
    %70 = arith.mulf %66, %69 : vector<4x256xf32>
    %71 = arith.addf %49, %70 : vector<4x256xf32>
    %c0_50 = arith.constant 0 : index
    %c0_51 = arith.constant 0 : index
    %72 = vector.load %arg4[%c0_50, %c0_51] : memref<8x4xf32, #tpu.memory_space<vmem>>, vector<8x4xf32>
    %cst_52 = arith.constant dense<0.000000e+00> : vector<8x256xf32>
    %73 = tpu.matmul %72, %71, %cst_52 {dimension_numbers = #tpu.dot_dimension_numbers<[1], [0], [0], [1], [0, 0, 1, 1], [], []>} : vector<8x4xf32>, vector<4x256xf32>, vector<8x256xf32> -> vector<8x256xf32>
    %c0_53 = arith.constant 0 : index
    %c0_54 = arith.constant 0 : index
    %74 = vector.load %arg5[%c0_53, %c0_54] : memref<8x1xf32, #tpu.memory_space<vmem>>, vector<8x1xf32>
    %75 = vector.broadcast %74 : vector<8x1xf32> to vector<8x256xf32>
    %76 = arith.addf %73, %75 : vector<8x256xf32>
    %cst_55 = arith.constant 0.000000e+00 : f32
    %77 = vector.broadcast %cst_55 : f32 to vector<8x256xf32>
    %78 = arith.maximumf %76, %77 : vector<8x256xf32>
    %c0_56 = arith.constant 0 : index
    %c0_57 = arith.constant 0 : index
    %c0_58 = arith.constant 0 : index
    %79 = vector.load %arg7[%c0_56, %c0_57, %c0_58] : memref<1x8x256xf32, #tpu.memory_space<vmem>>, vector<1x8x256xf32>
    %80 = vector.shape_cast %79 : vector<1x8x256xf32> to vector<8x256xf32>
    %81 = vector.shape_cast %78 : vector<8x256xf32> to vector<1x8x256xf32>
    tpu.vector_store %arg7[%c0_56, %c0_57, %c0_58], %81 {strides = array<i32>} : memref<1x8x256xf32, #tpu.memory_space<vmem>>, vector<1x8x256xf32>,
    return
  }
  func.func @transform_0(%arg0: i32, %arg1: i32) -> (i32, i32, i32) {
    %c0_i32 = arith.constant 0 : i32
    %c0_i32_0 = arith.constant 0 : i32
    return %arg0, %c0_i32, %arg1 : i32, i32, i32
  }
  func.func @transform_1(%arg0: i32, %arg1: i32) -> (i32, i32, i32) {
    %c0_i32 = arith.constant 0 : i32
    %c0_i32_0 = arith.constant 0 : i32
    %c0_i32_1 = arith.constant 0 : i32
    %c0_i32_2 = arith.constant 0 : i32
    return %c0_i32, %c0_i32_0, %c0_i32_1 : i32, i32, i32
  }
  func.func @transform_2(%arg0: i32, %arg1: i32) -> (i32, i32) {
    %c0_i32 = arith.constant 0 : i32
    %c0_i32_0 = arith.constant 0 : i32
    %c0_i32_1 = arith.constant 0 : i32
    return %c0_i32, %c0_i32_0 : i32, i32
  }
  func.func @transform_3(%arg0: i32, %arg1: i32) -> (i32, i32) {
    %c0_i32 = arith.constant 0 : i32
    %c0_i32_0 = arith.constant 0 : i32
    %c0_i32_1 = arith.constant 0 : i32
    return %c0_i32, %c0_i32_0 : i32, i32
  }
  func.func @transform_4(%arg0: i32, %arg1: i32) -> (i32, i32, i32) {
    %c0_i32 = arith.constant 0 : i32
    %c0_i32_0 = arith.constant 0 : i32
    %c0_i32_1 = arith.constant 0 : i32
    %c0_i32_2 = arith.constant 0 : i32
    return %c0_i32, %c0_i32_0, %c0_i32_1 : i32, i32, i32
  }
  func.func @transform_5(%arg0: i32, %arg1: i32) -> (i32, i32, i32) {
    %c0_i32 = arith.constant 0 : i32
    %c0_i32_0 = arith.constant 0 : i32
    return %arg0, %c0_i32, %arg1 : i32, i32, i32
  }
}

</mosaic_0001>

<bundles_post_ra>
// kernel: dsc_bn_act.1
= control target key start
LH: loop header
LB: loop body
LE: loop exit
PB: predicated region body
PF: predicated region fallthrough
CT: control target
= control target key end

     0   :  { %s879_s18 = smov 0   ;;  %s881_s19 = smov 0   ;;  %s1020_s0 = inlined_call_operand.vmem [shape: f32[2,4,256], index: 0, kind: input, shape index: {}]   ;;  %s1021_s1 = inlined_call_operand.vmem [shape: f32[9,4,1], index: 1, kind: input, shape index: {}]   ;;  %s1022_s2 = inlined_call_operand.vmem [shape: f32[8,4], index: 2, kind: input, shape index: {}]   ;;  %s1023_s3 = inlined_call_operand.vmem [shape: f32[8,1], index: 3, kind: input, shape index: {}]   ;;  %s1024_s4 = inlined_call_operand.vmem [shape: f32[3,1,256], index: 4, kind: input, shape index: {}]   ;;  %s1025_s5 = inlined_call_operand.vmem [shape: f32[2,8,256], index: 5, kind: output, shape index: {}]  }
   0x1   :  { %s883_s20 = smov 0  }
   0x2 LB: > { %s27_s21 = sadd.s32 1, %s834_s19  ;;  %p760_p0 = scmp.ge.s32.totalorder %s838_s20, 1  ;;  %s838_s20 = sphi %s883_s20, %s15_s20   ;;  %s834_s19 = sphi %s881_s19, %s1027_s19   ;;  %s830_s18 = sphi %s879_s18, %s1026_s18  }
   0x3   : > { %p29_p1 = scmp.ge.s32.totalorder %s27_s21, 2  ;;  %p208_p2 = scmp.lt.s32.totalorder %s838_s20, 3 }
   0x5   : > { %s1029_s21 = smov (%p29_p1, %s27_s21), 0  ;;  %p209_p3 = pnand %p760_p0, %p208_p2 }
   0x6   : > { %p245_p4 = scmp.lt.s32.totalorder (!%p209_p3), %s830_s18, 1  ;;  %s842_s30 = smov (!%p209_p3), 17  }
   0x7   : > { %212 = sbr.rel (%p209_p3) target bundleno = 609 (0x261), region = 40  ;;  %s844_s22 = smov (!%p209_p3), 112  }
   0x8   : > { %s845_s25 = smov (!%p209_p3), 96   ;;  %s846_s28 = smov (!%p209_p3), 2  }
   0xc   : > { %v771_v0 = vld [vmem:[%s1021_s1 + $0x14] sm:$0xf]  ;;  %v840_v1 = vmov 0   ;;  %vm264_vm0 = vcmask 3072   ;;  %s1031_s18 = smov (!%p245_p4, %s830_s18), 1  ;;  %v841_v3 = vmov 0.0   ;;  %v296_v16 = vlaneseq }
   0xd   : > { %815 = vset.pattern.permute.xlu1 %v840_v1  ;;  %814 = vset.pattern.permute.xlu0 %v840_v1  ;;  %v769_v2 = vld [vmem:[%s1021_s1 + $0x1c] sm:$0xf]  ;;  %265 = vst.msk [vmem:[#allocation2] sm:$0xf] %vm264_vm0, %v841_v3  ;;  %vm266_vm1 = vcmask 273672   ;;  %s779_s26 = sshll.u32 %s1031_s18, 3 }
   0xe   : > { %487 = vperm.xlu1 %815, %v771_v0   ;;  %658 = vmatprep.mubr.f32.mxu0 %v841_v3  ;;  %267 = vst.msk [vmem:[#allocation2 + $0x8] sm:$0xf] %vm266_vm1, %v841_v3  ;;  %s252_s29 = scalar_lea.vmem %s1020_s0, %s779_s26  ;;  %v772_v5 = vld [vmem:[%s1021_s1 + $0x20] sm:$0xf]  ;;  %v768_v6 = vld [vmem:[%s1021_s1 + $0x10] sm:$0xf] }
   0xf   : > { %v268_v4 = vld [vmem:[%s252_s29] sm:$0xff]  ;;  %v766_v7 = vld [vmem:[%s1021_s1 + $0x18] sm:$0xf]  ;;  %v765_v8 = vld [vmem:[%s1021_s1 + $0xc] sm:$0xf]  ;;  %vm277_vm2 = vcmask 1043592  }
  0x10   : > { %270 = vrot.lane.b32.xlu0 %v268_v4, %s842_s30  ;;  %v770_v9 = vld [vmem:[%s1021_s1 + $0x8] sm:$0xf]  ;;  %v767_v10 = vld [vmem:[%s1021_s1 + $0x4] sm:$0xf]  ;;  %vm278_vm3 = vcmask 1047556   ;;  %vm273_vm4 = vcmask 138240  }
  0x11   : > { %vm281_vm5 = vcmask 134144   ;;  %vm279_vm6 = vmor %vm278_vm3, %vm277_vm2  ;;  %vm285_vm7 = vcmask 265352   ;;  %vm283_vm8 = vcmask 134152   ;;  %v843_v14 = vmov 839922192   ;;  %s847_s29 = smov 127  }
  0x12   : > { %428 = vperm.xlu1 %815, %v769_v2   ;;  %v294_v15 = vunpack.c.l.s4 %v843_v14  ;;  %v927_v18 = vshrl.u32 %v296_v16, 7  ;;  %v773_v35 = vld [vmem:[%s1024_s4 + $0x4] sm:$0x3]  ;;  %v288_v45 = vld [vmem:[%s1021_s1] sm:$0xf]  ;;  %vm328_vm9 = vcmask 1043456  }
  0x13   : > { %vm330_vm10 = vcmask 916480   ;;  %vm359_vm11 = vcmask 785408   ;;  %vm558_vm12 = vcmask 15360   ;;  %s848_s30 = smov 126   ;;  %vm463_vm13 = vcmask 1039360   ;;  %s780_s12 = sshll.u32 %s1031_s18, 4 }
  0x14   : > { %398 = vperm.xlu0 %814, %v768_v6   ;;  %v295_v17 = vunpack.c.0.s8 %v294_v15  ;;  %v367_v33 = vsub.s32 0, %v927_v18  ;;  %v371_v34 = vsub.s32 1, %v927_v18  ;;  %vm573_vm14 = vcmask 1031168   ;;  %s262_s15 = scalar_lea.vmem %s1025_s5, %s780_s12 }
  0x15   : > { %vm586_vm15 = vcmask 31744  }
  0x16   : > { %517 = vperm.xlu1 %815, %v772_v5   ;;  %v930_v20 = vsub.s32 %v295_v17, %v927_v18  ;;  %v549_v39 = vrot.slane %v773_v35, %v367_v33  ;;  %v553_v40 = vrot.slane %v773_v35, %v371_v34 }
  0x18   : > { %308 = vperm.xlu0 %814, %v765_v8   ;;  %v554_v44 = vcombine.low %v549_v39, %v553_v40 }
  0x1a   : > { %338 = vperm.xlu1 %815, %v766_v7  }
  0x1c   : > { %382 = vperm.xlu0 %814, %v767_v10  }
  0x1e   : > { %471 = vperm.xlu1 %815, %v770_v9  }
  0x82   : > { %v271_v11 = vpop.permute.xlu0 %270 }
  0x83   : > { %v272_v12 = vrot.slane %v271_v11, 4 }
  0x85   : > { %v274_v13 = vsel %vm273_vm4, %v272_v12, %v271_v11  ;;  %282 = vst.msk [vmem:[#allocation2 + $0x8] sm:$0xf] %vm281_vm5, %v272_v12 }
  0x86   : > { %280 = vst.msk [vmem:[#allocation2] sm:$0xff] %vm279_vm6, %v274_v13 }
  0x87   : > { %286 = vst.msk [vmem:[#allocation2 + $0x8] sm:$0xf] %vm285_vm7, %v841_v3 }
  0x88   : > { %284 = vst.msk [vmem:[#allocation2] sm:$0xf] %vm283_vm8, %v841_v3 }
  0x89   : > { %v488_v19 = vpop.permute.xlu1 %487 }
  0x8a   : > { %v495_v26 = vrot.slane %v488_v19, %v930_v20 }
  0x8d   : > { %v429_v25 = vpop.permute.xlu1 %428 }
  0x8e   : > { %v932_v21 = vld [vmem:[#allocation2 + $0x8] sm:$0xf]  ;;  %v436_v31 = vrot.slane %v429_v25, %v930_v20 }
  0x8f   : > { %v399_v22 = vpop.permute.xlu0 %398  ;;  %v935_v24 = vld [vmem:[#allocation2] sm:$0xff]  ;;  %v498_v29 = vmul.f32 %v495_v26, %v932_v21  ;;  %v303_v48 = vld [vmem:[#allocation2 + $0x8] sm:$0xf] }
  0x90   : > { %v406_v23 = vrot.slane %v399_v22, %v930_v20  ;;  %v497_v30 = vmul.f32 %v495_v26, %v935_v24  ;;  %v438_v36 = vmul.f32 %v436_v31, %v935_v24  ;;  %v439_v37 = vmul.f32 %v436_v31, %v932_v21 }
  0x91   : > { %v518_v32 = vpop.permute.xlu1 %517 }
  0x92   : > { %v408_v27 = vmul.f32 %v406_v23, %v935_v24  ;;  %v409_v28 = vmul.f32 %v406_v23, %v932_v21  ;;  %v525_v38 = vrot.slane %v518_v32, %v930_v20 }
  0x93   : > { %v309_v43 = vpop.permute.xlu0 %308 }
  0x94   : > { %414 = vrot.lane.b32.xlu1 %v409_v28, %s844_s22  ;;  %412 = vrot.lane.b32.xlu0 %v408_v27, %s844_s22  ;;  %v527_v41 = vmul.f32 %v525_v38, %v935_v24  ;;  %v528_v42 = vmul.f32 %v525_v38, %v932_v21  ;;  %v316_v46 = vrot.slane %v309_v43, %v930_v20 }
  0x95   : > { %v339_v47 = vpop.permute.xlu1 %338 }
  0x96   : > { %v346_v49 = vrot.slane %v339_v47, %v930_v20  ;;  %v318_v50 = vmul.f32 %v935_v24, %v316_v46  ;;  %v319_v51 = vmul.f32 %v316_v46, %v303_v48 }
  0x97   : > { %v383_v55 = vpop.permute.xlu0 %382 }
  0x98   : > { %503 = vrot.lane.b32.xlu1 %v498_v29, %s844_s22  ;;  %501 = vrot.lane.b32.xlu0 %v497_v30, %s844_s22  ;;  %v348_v52 = vmul.f32 %v935_v24, %v346_v49  ;;  %v349_v53 = vmul.f32 %v346_v49, %v303_v48  ;;  %v390_v58 = vrot.slane %v383_v55, %v930_v20 }
  0x99   : > { %v472_v54 = vpop.permute.xlu1 %471 }
  0x9a   : > { %v393_v63 = vmul.f32 %v390_v58, %v932_v21  ;;  %v479_v4 = vrot.slane %v472_v54, %v930_v20  ;;  %v392_v5 = vmul.f32 %v390_v58, %v935_v24 }
  0x9c   : > { %444 = vrot.lane.b32.xlu1 %v439_v37, %s845_s25  ;;  %442 = vrot.lane.b32.xlu0 %v438_v36, %s845_s25  ;;  %v481_v15 = vmul.f32 %v479_v4, %v935_v24  ;;  %v482_v23 = vmul.f32 %v479_v4, %v932_v21  ;;  %v578_v21 = vld [vmem:[%s1023_s3] sm:$0xff] }
  0xa0   : > { %533 = vrot.lane.b32.xlu1 %v528_v42, %s845_s25  ;;  %531 = vrot.lane.b32.xlu0 %v527_v41, %s845_s25 }
  0xa4   : > { %291 = vperm.xlu1 %815, %v288_v45   ;;  %555 = vrot.lane.b32.xlu0 %v554_v44, %s846_s28 }
  0xa8   : > { %324 = vrot.lane.b32.xlu1 %v319_v51, %s844_s22  ;;  %322 = vrot.lane.b32.xlu0 %v318_v50, %s844_s22 }
  0xac   : > { %354 = vrot.lane.b32.xlu1 %v349_v53, %s845_s25  ;;  %352 = vrot.lane.b32.xlu0 %v348_v52, %s845_s25 }
 0x106   : > { %v415_v56 = vpop.permute.xlu1 %414  ;;  %v413_v57 = vpop.permute.xlu0 %412 }
 0x107   : > { %v417_v59 = vrot.slane %v415_v56, 4  ;;  %v416_v60 = vrot.slane %v413_v57, 4  ;;  %v423_v3 = vadd.f32 %v415_v56, %v393_v63 }
 0x109   : > { %v418_v0 = vsel %vm328_vm9, %v416_v60, %v417_v59 }
 0x10a   : > { %v504_v61 = vpop.permute.xlu1 %503  ;;  %v502_v62 = vpop.permute.xlu0 %501  ;;  %v419_v6 = vsel %vm330_vm10, %v413_v57, %v418_v0 }
 0x10b   : > { %v506_v1 = vrot.slane %v504_v61, 4  ;;  %v505_v2 = vrot.slane %v502_v62, 4  ;;  %v422_v13 = vadd.f32 %v419_v6, %v392_v5  ;;  %v512_v28 = vadd.f32 %v504_v61, %v482_v23 }
 0x10d   : > { %v507_v9 = vsel %vm328_vm9, %v505_v2, %v506_v1 }
 0x10e   : > { %v445_v7 = vpop.permute.xlu1 %444  ;;  %v443_v8 = vpop.permute.xlu0 %442  ;;  %v508_v16 = vsel %vm330_vm10, %v502_v62, %v507_v9  ;;  %v577_v9 = vld [vmem:[%s1022_s2] sm:$0xff] }
 0x10f   : > { %v447_v10 = vrot.slane %v445_v7, 4  ;;  %v453_v11 = vadd.f32 %v445_v7, %v423_v3  ;;  %v446_v12 = vrot.slane %v443_v8, 4  ;;  %v511_v29 = vadd.f32 %v508_v16, %v481_v15 }
 0x111   : > { %v448_v14 = vsel %vm328_vm9, %v446_v12, %v447_v10  ;;  %458 = vrot.lane.b32.xlu1 %v453_v11, %s847_s29 }
 0x112   : > { %v449_v17 = vsel %vm359_vm11, %v443_v8, %v448_v14  ;;  %v534_v19 = vpop.permute.xlu1 %533  ;;  %v532_v22 = vpop.permute.xlu0 %531 }
 0x113   : > { %v452_v25 = vadd.f32 %v449_v17, %v422_v13  ;;  %v536_v26 = vrot.slane %v534_v19, 4  ;;  %v535_v27 = vrot.slane %v532_v22, 4  ;;  %v542_v35 = vadd.f32 %v534_v19, %v512_v28 }
 0x115   : > { %v537_v30 = vsel %vm328_vm9, %v535_v27, %v536_v26  ;;  %456 = vrot.lane.b32.xlu0 %v452_v25, %s847_s29 }
 0x116   : > { %v538_v31 = vsel %vm359_vm11, %v532_v22, %v537_v30  ;;  %v556_v32 = vpop.permute.xlu0 %555 }
 0x117   : > { %v541_v36 = vadd.f32 %v538_v31, %v511_v29  ;;  %v557_v37 = vrot.slane %v556_v32, 4 }
 0x119   : > { %v559_v38 = vsel %vm558_vm12, %v557_v37, %v556_v32  ;;  %v563_v39 = vmul.f32 %v557_v37, %v542_v35 }
 0x11a   : > { %v562_v40 = vmul.f32 %v559_v38, %v541_v36  ;;  %v323_v41 = vpop.permute.xlu0 %322 }
 0x11b   : > { %568 = vrot.lane.b32.xlu1 %v563_v39, %s848_s30  ;;  %v326_v44 = vrot.slane %v323_v41, 4 }
 0x11c   : > { %566 = vrot.lane.b32.xlu0 %v562_v40, %s848_s30 }
 0x11e   : > { %v353_v47 = vpop.permute.xlu0 %352 }
 0x11f   : > { %v292_v42 = vpop.permute.xlu1 %291  ;;  %v356_v51 = vrot.slane %v353_v47, 4 }
 0x120   : > { %581 = vperm.xlu0 %814, %v578_v21   ;;  %v299_v45 = vrot.slane %v292_v42, %v930_v20  ;;  %v363_v20 = vld [vmem:[%s1024_s4] sm:$0x3] }
 0x121   : > { %v368_v59 = vrot.slane %v363_v20, %v367_v33  ;;  %v372_v60 = vrot.slane %v363_v20, %v371_v34 }
 0x122   : > { %v301_v52 = vmul.f32 %v935_v24, %v299_v45 }
 0x123   : > { %v325_v43 = vpop.permute.xlu1 %324  ;;  %v373_v63 = vcombine.low %v368_v59, %v372_v60 }
 0x124   : > { %v327_v46 = vrot.slane %v325_v43, 4 }
 0x126   : > { %v329_v48 = vsel %vm328_vm9, %v326_v44, %v327_v46 }
 0x127   : > { %v331_v49 = vsel %vm330_vm10, %v323_v41, %v329_v48  ;;  %v355_v50 = vpop.permute.xlu1 %354 }
 0x128   : > { %v357_v53 = vrot.slane %v355_v50, 4  ;;  %v333_v54 = vadd.f32 %v331_v49, %v301_v52 }
 0x12a   : > { %v358_v55 = vsel %vm328_vm9, %v356_v51, %v357_v53 }
 0x12b   : > { %v360_v56 = vsel %vm359_vm11, %v353_v47, %v358_v55 }
 0x12c   : > { %v362_v57 = vadd.f32 %v360_v56, %v333_v54 }
 0x12e   : > { %v375_v5 = vmul.f32 %v373_v63, %v362_v57 }
 0x183   : > { %v459_v58 = vpop.permute.xlu1 %458 }
 0x184   : > { %v461_v62 = vrot.slane %v459_v58, 4 }
 0x187   : > { %v457_v61 = vpop.permute.xlu0 %456 }
 0x188   : > { %v460_v24 = vrot.slane %v457_v61, 4 }
 0x18a   : > { %v462_v0 = vsel %vm328_vm9, %v460_v24, %v461_v62 }
 0x18b   : > { %v464_v2 = vsel %vm463_vm13, %v457_v61, %v462_v0 }
 0x18c   : > { %v466_v7 = vadd.f32 %v464_v2, %v375_v5 }
 0x18d   : > { %v569_v1 = vpop.permute.xlu1 %568 }
 0x18e   : > { %v571_v3 = vrot.slane %v569_v1, 4  ;;  %v567_v4 = vpop.permute.xlu0 %566 }
 0x18f   : > { %v570_v6 = vrot.slane %v567_v4, 4 }
 0x191   : > { %v572_v33 = vsel %vm328_vm9, %v570_v6, %v571_v3 }
 0x192   : > { %v574_v18 = vsel %vm573_vm14, %v567_v4, %v572_v33 }
 0x193   : > { %v576_v34 = vadd.f32 %v574_v18, %v466_v7 }
 0x195   : > { %v585_v8 = vcombine.high %v576_v34, %v576_v34 }
 0x197   : > { %774 = vmatprep.subr.msk.mxu0 %vm328_vm9, %v585_v8 }
 0x198   : > { %775 = vmatpush1.msk.msra.mxu0 %vm328_vm9, %v576_v34 }
 0x199   : > { %776 = vmatmul.mubr.msk.f32.vlgmr.msra.gmra.mxu0 %vm586_vm15, %v577_v9 }
 0x19b   : > { %v582_v10 = vpop.permute.xlu0 %581 }
 0x259   : > { %v660_v11 = vpop.f32.mrf.mxu0 }
 0x25a   : > { %v661_v12 = vadd.f32 %v660_v11, %v582_v10 }
 0x25b   : > { %v662_v13 = vpop.f32.mrf.mxu0 }
 0x25c   : > { %v665_v14 = vmax.f32 %v661_v12, 0.0  ;;  %v663_v15 = vadd.f32 %v662_v13, %v582_v10 }
 0x25e   : > { %667 = vst [vmem:[%s262_s15] sm:$0xff] %v665_v14  ;;  %v666_v16 = vmax.f32 %v663_v15, 0.0 }
 0x260   : > { %668 = vst [vmem:[%s262_s15 + $0x8] sm:$0xff] %v666_v16 }
 0x261 PF: > { %s15_s20 = sadd.s32 1, %s838_s20   ;;  %s1026_s18 = smov %s834_s19 }
 0x262   : > { %p12_p5 = scmp.ge.s32.totalorder %s15_s20, 4   ;;  %s1027_s19 = smov %s1029_s21 }
 0x264   :  { %14 = sbr.rel (!%p12_p5) target bundleno = 2 (0x2), region = 79 }

</bundles_post_ra>
